<compile_context>
chip_gen: v7x
topology: tpu7x:2x2x1
jax: 0.10.0
libtpu: 0.0.40
codegen_flags: <defaults>
</compile_context>

<pallas_src>
import functools

import jax
import jax.numpy as jnp
from jax.experimental import pallas as pl
from jax.experimental.pallas import tpu as pltpu

_LANE = 128


def _sublane_multiple(dtype):
    itemsize = jnp.dtype(dtype).itemsize
    if itemsize >= 4:
        return 8
    if itemsize == 2:
        return 16
    return 32


def _round_up(x, m):
    return -(-x // m) * m


def _pick_row_tile(rows_pad, sub, max_rows):
    """Largest multiple of `sub` dividing rows_pad, <= max_rows, >=2 grid steps."""
    upper = min(rows_pad, max(max_rows, sub))
    if rows_pad >= 2 * sub:  # keep >= 2 grid steps so both v7x TCs get work
        upper = min(upper, rows_pad // 2)
    upper = max(upper // sub * sub, sub)
    t = upper
    while t > sub:
        if rows_pad % t == 0:
            return t
        t -= sub
    return sub  # rows_pad is a multiple of sub, so sub always divides


# ---------- Path A: whole (row_tile, L) row block fits in VMEM ----------
def _group_norm_rows_kernel(x_ref, o_ref, *, eps):
    x = x_ref[...].astype(jnp.float32)
    inv_n = 1.0 / float(x.shape[-1])
    mean = jnp.sum(x, axis=-1, keepdims=True) * inv_n
    centered = x - mean
    var = jnp.sum(centered * centered, axis=-1, keepdims=True) * inv_n  # biased
    o_ref[...] = (centered * jax.lax.rsqrt(var + eps)).astype(o_ref.dtype)


# ---------- Path B: L chunked — pass 1 accumulates stats ----------
def _group_norm_stats_kernel(x_ref, mean_ref, rstd_ref, sum_ref, sq_ref, *,
                             eps, l_valid):
    k = pl.program_id(1)

    @pl.when(k == 0)
    def _():
        sum_ref[...] = jnp.zeros_like(sum_ref)
        sq_ref[...] = jnp.zeros_like(sq_ref)

    x = x_ref[...].astype(jnp.float32)
    sum_ref[...] += jnp.sum(x, axis=-1, keepdims=True)
    sq_ref[...] += jnp.sum(x * x, axis=-1, keepdims=True)

    @pl.when(k == pl.num_programs(1) - 1)
    def _():
        inv_n = 1.0 / float(l_valid)
        mean = sum_ref[...] * inv_n
        # lane/row padding is zero-filled so the sums are exact; biased variance
        var = jnp.maximum(sq_ref[...] * inv_n - mean * mean, 0.0)
        mean_ref[...] = mean
        rstd_ref[...] = jax.lax.rsqrt(var + eps)


# ---------- Path B: pass 2 applies the normalization ----------
def _group_norm_apply_kernel(x_ref, mean_ref, rstd_ref, o_ref):
    x = x_ref[...].astype(jnp.float32)
    o_ref[...] = ((x - mean_ref[...]) * rstd_ref[...]).astype(o_ref.dtype)


def group_norm(x, groups=32, eps=1e-5, *, block_budget_bytes=24 * 1024 * 1024):
    """GroupNorm over a (N, groups, -1) view, affine=False.  x: (N, C, H, W)."""
    N, C, H, W = x.shape
    assert C % groups == 0, "channels must be divisible by groups"
    L = (C // groups) * H * W
    rows = N * groups

    dtype = x.dtype
    itemsize = jnp.dtype(dtype).itemsize
    sub = _sublane_multiple(dtype)

    # VMEM lane tiles are physically padded to 128 lanes; budget with that.
    L_phys = _round_up(L, _LANE)
    rows_pad = _round_up(rows, sub)

    # 2 arrays (in + out), double buffered => ~4x one block lives in VMEM.
    per_array_bytes = max(block_budget_bytes // 4, sub * _LANE * itemsize)

    x2 = x.reshape(rows, L)

    if sub * L_phys * itemsize <= per_array_bytes:
        # ---- single-pass: whole rows per block; no lane padding needed since a
        # block dim equal to the full array dim is always legal.
        max_rows_budget = per_array_bytes // (L_phys * itemsize)
        row_tile = _pick_row_tile(rows_pad, sub, max_rows_budget)

        if rows_pad != rows:  # rare (groups=32 makes rows a multiple of 32)
            x2 = jnp.pad(x2, ((0, rows_pad - rows), (0, 0)))

        block_bytes = row_tile * L_phys * itemsize
        vmem_limit = int(min(max(4 * block_bytes + 16 * 1024 * 1024,
                                 32 * 1024 * 1024), 48 * 1024 * 1024))

        out2 = pl.pallas_call(
            functools.partial(_group_norm_rows_kernel, eps=eps),
            out_shape=jax.ShapeDtypeStruct((rows_pad, L), dtype),
            grid=(rows_pad // row_tile,),
            in_specs=[pl.BlockSpec((row_tile, L), lambda i: (i, 0))],
            out_specs=pl.BlockSpec((row_tile, L), lambda i: (i, 0)),
            compiler_params=pltpu.CompilerParams(
                dimension_semantics=("parallel",),
                vmem_limit_bytes=vmem_limit),
        )(x2)
    else:
        # ---- L-chunked two-pass path (bounds VMEM independent of H*W*C/groups)
        row_tile = sub
        l_tile = max(_LANE,
                     (per_array_bytes // (row_tile * itemsize)) // _LANE * _LANE)
        l_tile = min(l_tile, L_phys)
        L_final = _round_up(L_phys, l_tile)

        if (rows_pad, L_final) != (rows, L):
            x2 = jnp.pad(x2, ((0, rows_pad - rows), (0, L_final - L)))

        block_bytes = row_tile * l_tile * itemsize
        vmem_limit = int(min(max(4 * block_bytes + 16 * 1024 * 1024,
                                 32 * 1024 * 1024), 48 * 1024 * 1024))
        grid = (rows_pad // row_tile, L_final // l_tile)

        mean, rstd = pl.pallas_call(
            functools.partial(_group_norm_stats_kernel, eps=eps, l_valid=L),
            out_shape=(jax.ShapeDtypeStruct((rows_pad, 1), jnp.float32),
                       jax.ShapeDtypeStruct((rows_pad, 1), jnp.float32)),
            grid=grid,
            in_specs=[pl.BlockSpec((row_tile, l_tile), lambda i, k: (i, k))],
            out_specs=(pl.BlockSpec((row_tile, 1), lambda i, k: (i, 0)),
                       pl.BlockSpec((row_tile, 1), lambda i, k: (i, 0))),
            scratch_shapes=[pltpu.VMEM((row_tile, 1), jnp.float32),
                            pltpu.VMEM((row_tile, 1), jnp.float32)],
            compiler_params=pltpu.CompilerParams(
                dimension_semantics=("parallel", "arbitrary"),
                vmem_limit_bytes=vmem_limit),
        )(x2)

        out2 = pl.pallas_call(
            _group_norm_apply_kernel,
            out_shape=jax.ShapeDtypeStruct((rows_pad, L_final), dtype),
            grid=grid,
            in_specs=[pl.BlockSpec((row_tile, l_tile), lambda i, k: (i, k)),
                      pl.BlockSpec((row_tile, 1), lambda i, k: (i, 0)),
                      pl.BlockSpec((row_tile, 1), lambda i, k: (i, 0))],
            out_specs=pl.BlockSpec((row_tile, l_tile), lambda i, k: (i, k)),
            compiler_params=pltpu.CompilerParams(
                dimension_semantics=("parallel", "parallel"),
                vmem_limit_bytes=vmem_limit),
        )(x2, mean, rstd)

    if out2.shape != (rows, L):
        out2 = out2[:rows, :L]
    return out2.reshape(N, C, H, W)


def _reference(x, groups=32, eps=1e-5):
    N, C, H, W = x.shape
    xg = x.reshape(N, groups, -1).astype(jnp.float32)
    mean = jnp.mean(xg, axis=-1, keepdims=True)
    var = jnp.mean((xg - mean) ** 2, axis=-1, keepdims=True)
    y = (xg - mean) / jnp.sqrt(var + eps)
    return y.reshape(N, C, H, W).astype(x.dtype)


if __name__ == "__main__":
    key = jax.random.PRNGKey(0)
    groups = 32

    # 1) f32, L multiple of 128 (single-pass path)
    x = jax.random.normal(key, (2, 64, 8, 8), dtype=jnp.float32)
    y = jax.block_until_ready(group_norm(x, groups=groups))
    y_ref = _reference(x, groups=groups)
    assert y.shape == x.shape and y.dtype == x.dtype
    assert jnp.allclose(y, y_ref, atol=1e-5, rtol=1e-5)

    # 2) bf16 input (dtype-aware sublane tiling, f32 accumulation in-kernel)
    xb = jax.random.normal(jax.random.PRNGKey(1), (2, 64, 8, 8),
                           dtype=jnp.bfloat16)
    yb = jax.block_until_ready(group_norm(xb, groups=groups))
    assert yb.dtype == jnp.bfloat16
    assert jnp.allclose(yb.astype(jnp.float32),
                        _reference(xb, groups=groups).astype(jnp.float32),
                        atol=3e-2, rtol=3e-2)

    # 3) L not a multiple of 128 (full-L block, no pad/slice copies)
    xo = jax.random.normal(jax.random.PRNGKey(2), (2, 64, 6, 6),
                           dtype=jnp.float32)
    yo = jax.block_until_ready(group_norm(xo, groups=groups))
    assert jnp.allclose(yo, _reference(xo, groups=groups), atol=1e-5, rtol=1e-5)

    # 4) force the L-chunked two-pass path with a tiny block budget
    xc = jax.random.normal(jax.random.PRNGKey(3), (2, 64, 16, 16),
                           dtype=jnp.float32)
    yc = jax.block_until_ready(
        group_norm(xc, groups=groups, block_budget_bytes=32 * 1024))
    assert jnp.allclose(yc, _reference(xc, groups=groups), atol=1e-5, rtol=1e-5)

    print("KERNEL_OK")
</pallas_src>

<mosaic_0001>
module attributes {stable_mosaic.version = 11 : i64} {
  func.func @_group_norm_rows_kernel(%arg0: i32, %arg1: memref<32x128xf32, #tpu.memory_space<vmem>>, %arg2: memref<32x128xf32, #tpu.memory_space<vmem>>) attributes {dimension_semantics = [#tpu.dimension_semantics<parallel>], iteration_bounds = array<i64: 2>, scalar_prefetch = 0 : i64, scratch_operands = 0 : i64, tpu.core_type = #tpu.core_type<tc>, window_params = [{transform_indices = @transform_0, window_bounds = array<i64: 32, 128>}, {transform_indices = @transform_1, window_bounds = array<i64: 32, 128>}]} {
    %c0 = arith.constant 0 : index
    %c0_0 = arith.constant 0 : index
    %0 = vector.load %arg1[%c0, %c0_0] : memref<32x128xf32, #tpu.memory_space<vmem>>, vector<32x128xf32>
    %cst = arith.constant dense<0.000000e+00> : vector<32xf32>
    %1 = vector.multi_reduction <add>, %0, %cst [1] : vector<32x128xf32> to vector<32xf32>
    %2 = vector.shape_cast %1 : vector<32xf32> to vector<32x1xf32>
    %cst_1 = arith.constant 7.812500e-03 : f32
    %3 = vector.broadcast %cst_1 : f32 to vector<32x1xf32>
    %4 = arith.mulf %2, %3 : vector<32x1xf32>
    %5 = vector.broadcast %4 : vector<32x1xf32> to vector<32x128xf32>
    %6 = arith.subf %0, %5 : vector<32x128xf32>
    %7 = arith.mulf %6, %6 : vector<32x128xf32>
    %cst_2 = arith.constant dense<0.000000e+00> : vector<32xf32>
    %8 = vector.multi_reduction <add>, %7, %cst_2 [1] : vector<32x128xf32> to vector<32xf32>
    %9 = vector.shape_cast %8 : vector<32xf32> to vector<32x1xf32>
    %cst_3 = arith.constant 7.812500e-03 : f32
    %10 = vector.broadcast %cst_3 : f32 to vector<32x1xf32>
    %11 = arith.mulf %9, %10 : vector<32x1xf32>
    %cst_4 = arith.constant 9.99999974E-6 : f32
    %12 = vector.broadcast %cst_4 : f32 to vector<32x1xf32>
    %13 = arith.addf %11, %12 : vector<32x1xf32>
    %14 = math.rsqrt %13 : vector<32x1xf32>
    %15 = vector.broadcast %14 : vector<32x1xf32> to vector<32x128xf32>
    %16 = arith.mulf %6, %15 : vector<32x128xf32>
    %c0_5 = arith.constant 0 : index
    %c0_6 = arith.constant 0 : index
    %17 = vector.load %arg2[%c0_5, %c0_6] : memref<32x128xf32, #tpu.memory_space<vmem>>, vector<32x128xf32>
    tpu.vector_store %arg2[%c0_5, %c0_6], %16 {strides = array<i32>} : memref<32x128xf32, #tpu.memory_space<vmem>>, vector<32x128xf32>,
    return
  }
  func.func @transform_0(%arg0: i32) -> (i32, i32) {
    %c0_i32 = arith.constant 0 : i32
    %c0_i32_0 = arith.constant 0 : i32
    return %arg0, %c0_i32 : i32, i32
  }
  func.func @transform_1(%arg0: i32) -> (i32, i32) {
    %c0_i32 = arith.constant 0 : i32
    %c0_i32_0 = arith.constant 0 : i32
    return %arg0, %c0_i32 : i32, i32
  }
}

</mosaic_0001>

<bundles_post_ra>
// kernel: tpu_custom_call.1
= control target key start
LH: loop header
LB: loop body
LE: loop exit
PB: predicated region body
PF: predicated region fallthrough
CT: control target
= control target key end

     0   :  { %6 = vsyncpa [#allocation3], 0  ;;  %s630_s0 = inlined_call_operand.hbm [shape: f32[64,128], index: 0, kind: input, shape index: {}]   ;;  %s631_s1 = inlined_call_operand.hbm [shape: f32[64,128], index: 1, kind: output, shape index: {}]  }
   0x1   :  { %8 = vsyncpa [#allocation3 + $0x1], 0 }
   0x2   :  { %9 = vsyncpa [#allocation4], 0 }
   0x3   :  { %11 = vsyncpa [#allocation4 + $0x1], 0  ;;  %s464_s6 = smov 0   ;;  %s466_s7 = smov 0  }
   0x4   :  { %s468_s8 = smov 0   ;;  %s470_s9 = smov 0  }
   0x5 LB: > { %s485_s10 = sadd.s32 4294967295, %s446_s9   ;;  %s276_s11 = sadd.s32 4294967294, %s446_s9   ;;  %s446_s9 = sphi %s470_s9, %s644_s9   ;;  %s442_s8 = sphi %s468_s8, %s643_s8   ;;  %s438_s7 = sphi %s466_s7, %s642_s7   ;;  %s434_s6 = sphi %s464_s6, %s641_s6  }
   0x6   : > { %s489_s12 = sadd.s32 1, %s446_s9   ;;  %s24_s13 = sadd.s32 1, %s442_s8 }
   0x7   : > { %s21_s14 = ssub.s32 %s446_s9, %s489_s12  ;;  %p31_p0 = scmp.ne.s32.totalorder %s442_s8, %s438_s7 }
   0x8   : > { %p22_p1 = scmp.eq.s32.totalorder %s21_s14, 0  ;;  %p32_p2 = scmp.eq.s32.totalorder %s446_s9, 0 }
   0x9   : > { %p37_p3 = scmp.ne.s32.totalorder %s438_s7, %s434_s6  ;;  %p38_p4 = scmp.eq.s32.totalorder %s485_s10, 0 }
   0xa   : > { %s501_s15 = scalar_select %p22_p1, %s442_s8, %s24_s13  }
   0xb   : > { %p503_p5 = por %p32_p2, %p31_p0  ;;  %p507_p6 = por %p38_p4, %p37_p3 }
   0xc   : > { %p61_p7 = scmp.eq.s32.totalorder %s485_s10, 1  ;;  %p67_p8 = scmp.eq.s32.totalorder %s276_s11, 1 }
   0xd   : > { %p304_p10 = scmp.lt.s32.totalorder %s446_s9, 2  ;;  %s87_s20 = sand.u32 1, %s442_s8  }
   0xe   : > { %p514_p11 = por %p61_p7, %p31_p0  ;;  %p518_p12 = por %p67_p8, %p37_p3 }
   0xf   : > { %s290_s21 = sshll.u32 %s446_s9, 9  ;;  %s279_s22 = sshll.u32 %s87_s20, 5 }
  0x10   : > { %s635_s18 = scalar_select %p514_p11, 1, 0 }
  0x11   : > { %s636_s19 = scalar_select %p518_p12, 1, 0 }
  0x12   : > { %s527_s25 = scalar_lea.hbm %s630_s0, %s290_s21  ;;  %s91_s26 = scalar_lea.vmem [#allocation2], %s279_s22 }
  0x13   : > { %s98_s27 = sshll.u32 %s91_s26, 4  ;;  %p531_p13 = pnand %p304_p10, %p503_p5  ;;  %s535_s27 = int_to_ptr.vmem [resolvable:$true] %s98_s27 }
  0x14   : > { %s537_s29 = scalar_lea.sflag [#allocation3], %s87_s20  ;;  %s350_s30 = scalar_lea.hbm %s527_s25, 512 }
  0x15   : > { %p351_p0 = scmp.ne.s32.totalorder %s527_s25, %s350_s30  ;;  %p352_p1 = pneg %p531_p13 }
  0x16   : > { %s355_s4 = scalar_lea.hbm %s630_s0, 1024  ;;  %p356_p4 = scmp.lt.u32.totalorder %s527_s25, %s630_s0 }
  0x17   : > { %p353_p2 = pnand %p352_p1, %p351_p0  ;;  %p357_p5 = scmp.lt.u32.totalorder %s355_s4, %s350_s30 }
  0x18   : > { %p359_p8 = scmp.lt.u32.totalorder %s350_s30, %s527_s25 }
  0x19   : > { %p354_p3 = pneg %p353_p2  ;;  %p358_p7 = por %p357_p5, %p356_p4 }
  0x1b   : > { %p360_p10 = por %p359_p8, %p358_p7 }
  0x1d   : > { %p361_p9 = pnand %p360_p10, %p354_p3 }
  0x1f   : > { %364 = shalt.err (!%p361_p9)
}
  0x20   : > { %s365_s13 = scalar_lea.vmem %s535_s27, 512  ;;  %s448_s14 = smov [#allocation2]  }
  0x21   : > { %p366_p0 = scmp.ne.s32.totalorder %s535_s27, %s365_s13  ;;  %s370_s16 = sshll.u32 %s448_s14, 4  ;;  %s371_s16 = int_to_ptr.vmem [resolvable:$false] %s370_s16 }
  0x22   : > { %s372_s20 = scalar_lea.vmem %s371_s16, 1024  ;;  %p373_p11 = scmp.lt.s32.totalorder %s535_s27, %s371_s16 }
  0x23   : > { %p368_p2 = pnand %p366_p0, %p352_p1  ;;  %p374_p4 = scmp.lt.s32.totalorder %s372_s20, %s365_s13 }
  0x25   : > { %p369_p12 = pneg %p368_p2  ;;  %p375_p5 = por %p374_p4, %p373_p11 }
  0x27   : > { %p376_p7 = pnand %p375_p5, %p369_p12 }
  0x29   : > { %379 = shalt.err (!%p376_p7)
}
  0x2a   : > { %s449_s21 = smov 128   ;;  %s450_s22 = smov 8  }
  0x2b   : > { %299 = dma.hbm_to_vmem [thread:$0]  (!%p531_p13), %s527_s25, 512, %s535_s27, %s537_s29, %s449_s21, %s449_s21, %s450_s22  }
  0x2c   : > { %p282_p9 = scmp.ge.s32.totalorder %s446_s9, 1  ;;  %p106_p1 = scmp.lt.s32.totalorder %s446_s9, 3 }
  0x2e   : > { %p107_p3 = pnand %p282_p9, %p106_p1 }
  0x2f   : > { %s568_s23 = sand.u32 (!%p107_p3), 1, %s438_s7  }
  0x30   : > { %110 = sbr.rel (%p107_p3) target bundleno = 387 (0x183), region = 24  ;;  %s283_s24 = sshll.u32 (!%p107_p3), %s568_s23, 5 }
  0x31   : > { %s113_s26 = scalar_lea.sflag (!%p107_p3), [#allocation3], %s568_s23  ;;  %s116_s30 = scalar_lea.vmem (!%p107_p3), [#allocation2], %s283_s24 }
  0x37   : > { %425 = dma.done.wait (%p507_p6), %s113_s26, 512  }
  0x38   : > { %427 = vsyncadd (%p507_p6), %s113_s26, 4294966784  ;;  %v137_v0 = vld [vmem:[%s116_s30] sm:$0xff]  ;;  %v139_v1 = vld [vmem:[%s116_s30 + $0x10] sm:$0xff]  ;;  %s134_s17 = scalar_lea.vmem [#allocation5], %s283_s24  ;;  %s291_s25 = sshll.u32 %s485_s10, 9 }
  0x39   : > { %141 = vadd.xlane.f32.xlu0 %v137_v0  ;;  %145 = vadd.xlane.f32.xlu1 %v139_v1  ;;  %v138_v2 = vld [vmem:[%s116_s30 + $0x8] sm:$0xff]  ;;  %v140_v3 = vld [vmem:[%s116_s30 + $0x18] sm:$0xff]  ;;  %s203_s27 = sshll.u32 %s134_s17, 4  ;;  %s584_s2 = scalar_lea.hbm %s631_s1, %s291_s25  ;;  %s586_s27 = int_to_ptr.vmem [resolvable:$true] %s203_s27 }
  0x3a   : > { %s190_s3 = scalar_lea.sflag [#allocation4], %s568_s23  ;;  %s380_s4 = scalar_lea.vmem %s586_s27, 512 }
  0x3b   : > { %p381_p6 = scmp.ne.s32.totalorder %s586_s27, %s380_s4  ;;  %p638_p11 = scmp.ne.s32.totalorder %s635_s18, 0 }
  0x3c   : > { %s451_s10 = smov [#allocation5]  }
  0x3d   : > { %143 = vadd.xlane.f32.xlu0 %v138_v2  ;;  %147 = vadd.xlane.f32.xlu1 %v140_v3  ;;  %p382_p12 = pnand %p381_p6, %p638_p11  ;;  %s384_s5 = sshll.u32 %s451_s10, 4  ;;  %s385_s5 = int_to_ptr.vmem [resolvable:$false] %s384_s5 }
  0x3e   : > { %s386_s11 = scalar_lea.vmem %s385_s5, 1024  ;;  %p387_p8 = scmp.lt.s32.totalorder %s586_s27, %s385_s5 }
  0x3f   : > { %p383_p13 = pneg %p382_p12  ;;  %p388_p10 = scmp.lt.s32.totalorder %s386_s11, %s380_s4 }
  0x41   : > { %p389_p0 = por %p388_p10, %p387_p8 }
  0x43   : > { %p390_p2 = pnand %p389_p0, %p383_p13 }
  0xc6   : > { %v142_v4 = vpop.xlane.xlu0 %141  ;;  %v146_v5 = vpop.xlane.xlu1 %145 }
  0xc7   : > { %v149_v6 = vmul.f32 0.0078125, %v142_v4  ;;  %v151_v7 = vmul.f32 0.0078125, %v146_v5 }
  0xc9   : > { %v153_v8 = vsub.f32 %v137_v0, %v149_v6  ;;  %v155_v9 = vsub.f32 %v139_v1, %v151_v7 }
  0xca   : > { %v144_v10 = vpop.xlane.xlu0 %143  ;;  %v148_v11 = vpop.xlane.xlu1 %147 }
  0xcb   : > { %v150_v12 = vmul.f32 0.0078125, %v144_v10  ;;  %v157_v13 = vmul.f32 %v153_v8, %v153_v8  ;;  %v152_v14 = vmul.f32 0.0078125, %v148_v11  ;;  %v159_v17 = vmul.f32 %v155_v9, %v155_v9 }
  0xcd   : > { %v154_v15 = vsub.f32 %v138_v2, %v150_v12  ;;  %161 = vadd.xlane.f32.xlu0 %v157_v13  ;;  %v156_v16 = vsub.f32 %v140_v3, %v152_v14 }
  0xcf   : > { %v158_v18 = vmul.f32 %v154_v15, %v154_v15  ;;  %v160_v19 = vmul.f32 %v156_v16, %v156_v16 }
  0xd1   : > { %165 = vadd.xlane.f32.xlu0 %v159_v17  ;;  %163 = vadd.xlane.f32.xlu1 %v158_v18 }
  0xd5   : > { %167 = vadd.xlane.f32.xlu1 %v160_v19 }
 0x15a   : > { %v162_v20 = vpop.xlane.xlu0 %161 }
 0x15b   : > { %v169_v21 = vmul.f32 0.0078125, %v162_v20 }
 0x15d   : > { %v173_v22 = vadd.f32 1e-05, %v169_v21 }
 0x15e   : > { %v164_v23 = vpop.xlane.xlu1 %163  ;;  %v166_v24 = vpop.xlane.xlu0 %165 }
 0x15f   : > { %342 = vrsqrt.f32 %v173_v22  ;;  %v170_v25 = vmul.f32 0.0078125, %v164_v23  ;;  %v171_v26 = vmul.f32 0.0078125, %v166_v24 }
 0x161   : > { %v174_v27 = vadd.f32 1e-05, %v170_v25  ;;  %v175_v28 = vadd.f32 1e-05, %v171_v26 }
 0x162   : > { %v168_v29 = vpop.xlane.xlu1 %167 }
 0x163   : > { %344 = vrsqrt.f32 %v174_v27  ;;  %v172_v30 = vmul.f32 0.0078125, %v168_v29 }
 0x164   : > { %346 = vrsqrt.f32 %v175_v28 }
 0x165   : > { %v176_v31 = vadd.f32 1e-05, %v172_v30 }
 0x167   : > { %348 = vrsqrt.f32 %v176_v31 }
 0x169   : > { %v343_v32 = vpop.eup %342 }
 0x16a   : > { %v181_v33 = vmul.f32 %v343_v32, %v153_v8 }
 0x16c   : > { %185 = vst [vmem:[%s134_s17] sm:$0xff] %v181_v33 }
 0x16d   : > { %v345_v34 = vpop.eup %344 }
 0x16e   : > { %v347_v35 = vpop.eup %346  ;;  %v182_v36 = vmul.f32 %v345_v34, %v154_v15 }
 0x16f   : > { %v183_v37 = vmul.f32 %v347_v35, %v155_v9 }
 0x170   : > { %186 = vst [vmem:[%s134_s17 + $0x8] sm:$0xff] %v182_v36 }
 0x171   : > { %v349_v38 = vpop.eup %348  ;;  %187 = vst [vmem:[%s134_s17 + $0x10] sm:$0xff] %v183_v37 }
 0x172   : > { %v184_v39 = vmul.f32 %v349_v38, %v156_v16 }
 0x174   : > { %188 = vst [vmem:[%s134_s17 + $0x18] sm:$0xff] %v184_v39 }
 0x175   : > { %393 = shalt.err (!%p390_p2)
}
 0x176   : > { %s394_s13 = scalar_lea.hbm %s584_s2, 512  ;;  %s398_s20 = scalar_lea.hbm %s631_s1, 1024 }
 0x177   : > { %p395_p4 = scmp.ne.s32.totalorder %s584_s2, %s394_s13  ;;  %p399_p9 = scmp.lt.u32.totalorder %s584_s2, %s631_s1 }
 0x178   : > { %p400_p1 = scmp.lt.u32.totalorder %s398_s20, %s394_s13  ;;  %p402_p6 = scmp.lt.u32.totalorder %s394_s13, %s584_s2 }
 0x179   : > { %p396_p5 = pnand %p395_p4, %p638_p11 }
 0x17a   : > { %p401_p3 = por %p400_p1, %p399_p9 }
 0x17b   : > { %p397_p7 = pneg %p396_p5 }
 0x17c   : > { %p403_p12 = por %p402_p6, %p401_p3 }
 0x17e   : > { %p404_p13 = pnand %p403_p12, %p397_p7 }
 0x180   : > { %407 = shalt.err (!%p404_p13)
}
 0x181   : > { %s452_s24 = smov 128   ;;  %s453_s26 = smov 8  }
 0x182   : > { %294 = dma.vmem_to_hbm [thread:$0]  (%p638_p11), %s586_s27, 512, %s584_s2, %s190_s3, %s452_s24, %s452_s24, %s453_s26  }
 0x183 PF: > { %s218_s30 = sand.u32 1, %s434_s6   ;;  %p639_p8 = scmp.ne.s32.totalorder %s636_s19, 0 }
 0x184   : > { %p640_p10 = scmp.ge.s32.totalorder %s446_s9, 2  ;;  %s219_s17 = scalar_lea.sflag [#allocation4], %s218_s30 }
 0x186   : > { %p301_p0 = pnand %p640_p10, %p639_p8 }
 0x188   : > { %429 = dma.done.wait (!%p301_p0), %s219_s17, 512  }
 0x189   : > { %431 = vsyncadd (!%p301_p0), %s219_s17, 4294966784  ;;  %p14_p2 = scmp.ge.s32.totalorder %s489_s12, 4   ;;  %s641_s6 = smov %s438_s7 }
 0x18a   : > { %s642_s7 = smov %s442_s8  ;;  %s643_s8 = smov %s501_s15 }
 0x18b   : > { %s644_s9 = smov %s489_s12  ;;  %16 = sbr.rel (!%p14_p2) target bundleno = 5 (0x5), region = 69 }
 0x192   :  { %224 = vsyncpa [#allocation3], 1 }
 0x193   :  { %226 = vsyncpa [#allocation3 + $0x1], 1 }
 0x194   :  { %227 = vsyncpa [#allocation4], 1 }
 0x195   :  { %229 = vsyncpa [#allocation4 + $0x1], 1 }

</bundles_post_ra>
